<compile_context>
chip_gen: v6e
topology: v6e:2x2x1
jax: 0.10.0
libtpu: 0.0.40
codegen_flags: <defaults>
</compile_context>

<pallas_src>
import numpy as np
import jax
import jax.numpy as jnp
from jax.experimental import pallas as pl
from jax.experimental.pallas import tpu as pltpu
from functools import partial

# ----------------------------- config -----------------------------
NUM_HEADS = 4          # dim must be divisible by num_heads
# TODO(synk): attn_drop / proj_drop with p > 0 would need pltpu.prng_* in-kernel;
#             module defaults are 0.0 (identity), so dropout is a no-op here.


def _attention_kernel(x_ref, wqkv_ref, wproj_ref, bproj_ref, out_ref, *rest,
                      num_heads, write_attn, compute_dtype):
    """One batch tile per grid step.

    x_ref:     (bt, N, C)      input tokens
    wqkv_ref:  (C, 3C)         fused qkv projection weight (q columns pre-scaled)
    wproj_ref: (C, C)          output projection weight
    bproj_ref: (1, C)          output projection bias (f32)
    out_ref:   (bt, N, C)      projected output
    attn_ref:  (bt, H, N, N)   softmax attention weights (only if write_attn)
    ctx_ref:   (bt, N, C)      VMEM scratch, concat-heads context (f32)
    """
    if write_attn:
        attn_ref, ctx_ref = rest
    else:
        (ctx_ref,) = rest
        attn_ref = None

    bt, n, c = x_ref.shape
    hd = c // num_heads
    m = bt * n

    def to_mxu(a):
        return a if compute_dtype is None else a.astype(compute_dtype)

    # Fold the batch tile into the matmul row dimension (leading-dim merge: free).
    x2 = to_mxu(x_ref[...].reshape(m, c))                        # (M, C), M = bt*N

    # Fused, lane-dense QKV projection: K = C contraction, 3C output lanes.
    qkv = jnp.dot(x2, wqkv_ref[...], preferred_element_type=jnp.float32)   # (M, 3C)
    q = qkv[:, 0 * c:1 * c]        # softmax scale already folded into these columns
    k = qkv[:, 1 * c:2 * c]
    v = qkv[:, 2 * c:3 * c]

    # Per-head attention.  Heavy matmuls stay outside this loop; each head's
    # results are stored to refs immediately so per-head live ranges stay bounded.
    for h in range(num_heads):
        lo, hi = h * hd, (h + 1) * hd
        qh = q[:, lo:hi].reshape(bt, n, hd)
        kh = k[:, lo:hi].reshape(bt, n, hd)
        vh = v[:, lo:hi].reshape(bt, n, hd)

        # Scaled dot-product scores (scale pre-folded): (bt, N, N), f32 accumulation.
        s = jnp.einsum('bqd,bkd->bqk', to_mxu(qh), to_mxu(kh),
                       preferred_element_type=jnp.float32)

        # Numerically stable softmax; divide via EUP reciprocal + one Newton step.
        s_max = jnp.max(s, axis=-1, keepdims=True)
        e = jnp.exp(s - s_max)
        denom = jnp.sum(e, axis=-1, keepdims=True)
        inv = pl.reciprocal(denom, approx=True)          # EUP slot (nearly free)
        inv = inv * (2.0 - denom * inv)                  # refine to ~f32 accuracy
        attn = e * inv                                   # (bt, N, N)

        if attn_ref is not None:
            attn_ref[:, h, :, :] = attn.astype(attn_ref.dtype)   # pre-dropout clone

        ctxh = jnp.einsum('bqk,bkd->bqd', to_mxu(attn), to_mxu(vh),
                          preferred_element_type=jnp.float32)    # (bt, N, hd)
        # Assemble concat-heads layout in VMEM scratch (matches torch transpose+reshape).
        ctx_ref[:, :, lo:hi] = ctxh

    # Single full-width output projection: (M, C) @ (C, C), K = C packs the MXU.
    ctx2 = to_mxu(ctx_ref[...].reshape(m, c))
    y = jnp.dot(ctx2, wproj_ref[...], preferred_element_type=jnp.float32)
    y = y + bproj_ref[...]                               # (M, C) + (1, C), f32
    out_ref[...] = y.reshape(bt, n, c).astype(out_ref.dtype)


def attention_forward(x, w_qkv, w_proj, b_proj, *, num_heads=NUM_HEADS,
                      return_attn_weights=True, batch_tile=None,
                      matmul_dtype=None, attn_dtype=jnp.float32):
    """Multi-head attention forward.

    x:       (B, N, C)
    w_qkv:   (C, 3C)   qkv weight, (in, out) layout; column order (3, H, hd)
    w_proj:  (C, C)    output projection weight, (in, out) layout
    b_proj:  (C,)      output projection bias
    matmul_dtype: None     -> f32 matmul operands (exact, safe on v5e)
                  bfloat16 -> bf16 operands / f32 accumulation (v6e/v7x MXU peak)
    attn_dtype:   dtype of the returned attention weights (bf16 halves HBM traffic).
    """
    B, N, C = x.shape
    assert C % num_heads == 0
    hd = C // num_heads
    scale = hd ** (-0.5)

    # Fold the softmax scale into the q-projection columns once (wrapper-side XLA op).
    w_qkv_fused = w_qkv.at[:, :C].multiply(scale)
    wp = w_proj
    bp = b_proj.reshape(1, C).astype(jnp.float32)
    if matmul_dtype is not None:
        w_qkv_fused = w_qkv_fused.astype(matmul_dtype)
        wp = wp.astype(matmul_dtype)

    # Batch tile: target ~256 fused matmul rows (bt*N) for MXU packing, keep it a
    # divisor of B, and keep at least 2 grid steps when B allows so v7x's two
    # TensorCores both get work under the "parallel" grid axis.
    if batch_tile is None:
        batch_tile = min(B, max(1, 256 // max(N, 1)))
    batch_tile = max(1, min(B, batch_tile))
    while B % batch_tile:
        batch_tile -= 1
    while (B // batch_tile) < 2 and batch_tile > 1:
        batch_tile = max(1, batch_tile // 2)
        while B % batch_tile:
            batch_tile -= 1
    bt = batch_tile
    grid = (B // bt,)

    kernel = partial(_attention_kernel, num_heads=num_heads,
                     write_attn=return_attn_weights, compute_dtype=matmul_dtype)

    out_shapes = [jax.ShapeDtypeStruct((B, N, C), x.dtype)]
    out_specs = [pl.BlockSpec((bt, N, C), lambda b: (b, 0, 0))]
    if return_attn_weights:
        out_shapes.append(jax.ShapeDtypeStruct((B, num_heads, N, N), attn_dtype))
        out_specs.append(pl.BlockSpec((bt, num_heads, N, N), lambda b: (b, 0, 0, 0)))

    # VMEM budget from the actual working set: double-buffered x/out/attn tiles,
    # double-buffered constant-index weights, ctx scratch, q/k/v intermediates.
    # Capped at 32 MiB so it is a valid scoped limit on v5e/v6e/v7x alike.
    wbytes = np.dtype(matmul_dtype).itemsize if matmul_dtype is not None else 4
    abytes = np.dtype(attn_dtype).itemsize
    est = (2 * bt * N * C * x.dtype.itemsize            # x (double-buffered)
           + 2 * bt * N * C * x.dtype.itemsize          # out
           + (2 * bt * num_heads * N * N * abytes if return_attn_weights else 0)
           + 2 * (3 * C * C + C * C + C) * wbytes       # weights (double-buffered)
           + bt * N * C * 4                             # ctx scratch (f32)
           + 6 * bt * N * C * 4)                        # q/k/v + intermediate headroom
    vmem_limit = int(min(max(2 * est, 8 << 20), 32 << 20))

    results = pl.pallas_call(
        kernel,
        out_shape=tuple(out_shapes),
        grid_spec=pltpu.PrefetchScalarGridSpec(
            num_scalar_prefetch=0,
            grid=grid,
            in_specs=[
                pl.BlockSpec((bt, N, C), lambda b: (b, 0, 0)),      # x
                pl.BlockSpec((C, 3 * C), lambda b: (0, 0)),         # fused Wqkv (q pre-scaled)
                pl.BlockSpec((C, C), lambda b: (0, 0)),             # Wproj
                pl.BlockSpec((1, C), lambda b: (0, 0)),             # bias
            ],
            out_specs=tuple(out_specs),
            scratch_shapes=[pltpu.VMEM((bt, N, C), jnp.float32)],   # concat-heads ctx
        ),
        compiler_params=pltpu.CompilerParams(
            dimension_semantics=("parallel",),
            vmem_limit_bytes=vmem_limit,
        ),
    )(x, w_qkv_fused, wp, bp)

    if return_attn_weights:
        out, attn = results
        return out, attn
    return results[0]


def attention_reference(x, w_qkv, w_proj, b_proj, *, num_heads=NUM_HEADS):
    """Pure-JAX reference mirroring the PyTorch forward."""
    B, N, C = x.shape
    hd = C // num_heads
    scale = hd ** (-0.5)
    qkv = (x @ w_qkv).reshape(B, N, 3, num_heads, hd).transpose(2, 0, 3, 1, 4)
    q, k, v = qkv[0], qkv[1], qkv[2]                      # (B, H, N, hd)
    attn = jnp.einsum("bhnd,bhmd->bhnm", q, k) * scale
    attn = jax.nn.softmax(attn, axis=-1)
    ctx = jnp.einsum("bhnm,bhmd->bhnd", attn, v)          # (B, H, N, hd)
    ctx = ctx.transpose(0, 2, 1, 3).reshape(B, N, C)
    out = ctx @ w_proj + b_proj
    return out, attn


if __name__ == "__main__":
    B, N, C = 2, 8, 32

    key = jax.random.PRNGKey(0)
    kx, kqkv, kproj, kb = jax.random.split(key, 4)

    x = jax.random.normal(kx, (B, N, C), dtype=jnp.float32)
    # deterministic synthetic parameters (in_features, out_features layout)
    w_qkv = jax.random.normal(kqkv, (C, 3 * C), dtype=jnp.float32) * 0.05
    w_proj = jax.random.normal(kproj, (C, C), dtype=jnp.float32) * 0.05
    b_proj = jax.random.normal(kb, (C,), dtype=jnp.float32) * 0.05

    ref_out, ref_attn = attention_reference(x, w_qkv, w_proj, b_proj, num_heads=NUM_HEADS)

    # Exact (f32-operand) path, with attention weights.
    out, attn_w = attention_forward(x, w_qkv, w_proj, b_proj, num_heads=NUM_HEADS)
    out = jax.block_until_ready(out)
    attn_w = jax.block_until_ready(attn_w)
    assert out.shape == (B, N, C)
    assert attn_w.shape == (B, NUM_HEADS, N, N)
    assert jnp.allclose(out, ref_out, atol=1e-3, rtol=1e-3), \
        float(jnp.max(jnp.abs(out - ref_out)))
    assert jnp.allclose(attn_w, ref_attn, atol=1e-3, rtol=1e-3), \
        float(jnp.max(jnp.abs(attn_w - ref_attn)))

    # Output-only fast path (drops the O(B*H*N^2) attention-weights HBM writeback).
    out_only = attention_forward(x, w_qkv, w_proj, b_proj, num_heads=NUM_HEADS,
                                 return_attn_weights=False)
    out_only = jax.block_until_ready(out_only)
    assert jnp.allclose(out_only, ref_out, atol=1e-3, rtol=1e-3)

    # bf16-operand path (v6e/v7x MXU peak; f32 accumulation) — relaxed tolerance.
    out_bf16 = attention_forward(x, w_qkv, w_proj, b_proj, num_heads=NUM_HEADS,
                                 return_attn_weights=False,
                                 matmul_dtype=jnp.bfloat16)
    out_bf16 = jax.block_until_ready(out_bf16)
    assert jnp.allclose(out_bf16, ref_out, atol=5e-2, rtol=5e-2), \
        float(jnp.max(jnp.abs(out_bf16 - ref_out)))

    print("KERNEL_OK")
</pallas_src>

<mosaic_0001>
module attributes {stable_mosaic.version = 11 : i64} {
  func.func @_attention_kernel(%arg0: i32, %arg1: memref<1x8x32xf32, #tpu.memory_space<vmem>>, %arg2: memref<32x96xf32, #tpu.memory_space<vmem>>, %arg3: memref<32x32xf32, #tpu.memory_space<vmem>>, %arg4: memref<1x32xf32, #tpu.memory_space<vmem>>, %arg5: memref<1x8x32xf32, #tpu.memory_space<vmem>>, %arg6: memref<1x4x8x8xf32, #tpu.memory_space<vmem>>, %arg7: memref<1x8x32xf32, #tpu.memory_space<vmem>>) attributes {dimension_semantics = [#tpu.dimension_semantics<parallel>], iteration_bounds = array<i64: 2>, scalar_prefetch = 0 : i64, scratch_operands = 1 : i64, tpu.core_type = #tpu.core_type<tc>, window_params = [{transform_indices = @transform_0, window_bounds = array<i64: 1, 8, 32>}, {pipeline_mode = #tpu.pipeline_mode<synchronous>, transform_indices = @transform_1, window_bounds = array<i64: 32, 96>}, {pipeline_mode = #tpu.pipeline_mode<synchronous>, transform_indices = @transform_2, window_bounds = array<i64: 32, 32>}, {pipeline_mode = #tpu.pipeline_mode<synchronous>, transform_indices = @transform_3, window_bounds = array<i64: 1, 32>}, {transform_indices = @transform_4, window_bounds = array<i64: 1, 8, 32>}, {transform_indices = @transform_5, window_bounds = array<i64: 1, 4, 8, 8>}]} {
    %c0 = arith.constant 0 : index
    %c0_0 = arith.constant 0 : index
    %c0_1 = arith.constant 0 : index
    %0 = vector.load %arg1[%c0, %c0_0, %c0_1] : memref<1x8x32xf32, #tpu.memory_space<vmem>>, vector<1x8x32xf32>
    %1 = vector.shape_cast %0 : vector<1x8x32xf32> to vector<8x32xf32>
    %c0_2 = arith.constant 0 : index
    %c0_3 = arith.constant 0 : index
    %2 = vector.load %arg2[%c0_2, %c0_3] : memref<32x96xf32, #tpu.memory_space<vmem>>, vector<32x96xf32>
    %cst = arith.constant dense<0.000000e+00> : vector<8x96xf32>
    %3 = tpu.matmul %1, %2, %cst {dimension_numbers = #tpu.dot_dimension_numbers<[1], [0], [0], [1], [0, 0, 1, 1], [], []>} : vector<8x32xf32>, vector<32x96xf32>, vector<8x96xf32> -> vector<8x96xf32>
    %4 = vector.extract_strided_slice %3 {offsets = [0, 0], sizes = [8, 32], strides = [1, 1]} : vector<8x96xf32> to vector<8x32xf32>
    %5 = vector.extract_strided_slice %3 {offsets = [0, 32], sizes = [8, 32], strides = [1, 1]} : vector<8x96xf32> to vector<8x32xf32>
    %6 = vector.extract_strided_slice %3 {offsets = [0, 64], sizes = [8, 32], strides = [1, 1]} : vector<8x96xf32> to vector<8x32xf32>
    %7 = vector.extract_strided_slice %4 {offsets = [0, 0], sizes = [8, 8], strides = [1, 1]} : vector<8x32xf32> to vector<8x8xf32>
    %8 = vector.shape_cast %7 : vector<8x8xf32> to vector<1x8x8xf32>
    %9 = vector.extract_strided_slice %5 {offsets = [0, 0], sizes = [8, 8], strides = [1, 1]} : vector<8x32xf32> to vector<8x8xf32>
    %10 = vector.shape_cast %9 : vector<8x8xf32> to vector<1x8x8xf32>
    %11 = vector.extract_strided_slice %6 {offsets = [0, 0], sizes = [8, 8], strides = [1, 1]} : vector<8x32xf32> to vector<8x8xf32>
    %12 = vector.shape_cast %11 : vector<8x8xf32> to vector<1x8x8xf32>
    "tpu.trace_start"() <{level = 10 : i32, message = "bqd,bkd->bqk"}> : () -> ()
    %cst_4 = arith.constant dense<0.000000e+00> : vector<1x8x8xf32>
    %13 = tpu.matmul %8, %10, %cst_4 {dimension_numbers = #tpu.dot_dimension_numbers<[2], [2], [1], [1], [0, 0, 0, 1, 1, 1], [0], [0]>} : vector<1x8x8xf32>, vector<1x8x8xf32>, vector<1x8x8xf32> -> vector<1x8x8xf32>
    "tpu.trace_stop"() : () -> ()
    %cst_5 = arith.constant dense<0xFF800000> : vector<1x8xf32>
    %14 = vector.multi_reduction <maximumf>, %13, %cst_5 [2] : vector<1x8x8xf32> to vector<1x8xf32>
    %15 = vector.shape_cast %14 : vector<1x8xf32> to vector<1x8x1xf32>
    %16 = vector.broadcast %15 : vector<1x8x1xf32> to vector<1x8x8xf32>
    %17 = arith.subf %13, %16 : vector<1x8x8xf32>
    %18 = math.exp %17 : vector<1x8x8xf32>
    %cst_6 = arith.constant dense<0.000000e+00> : vector<1x8xf32>
    %19 = vector.multi_reduction <add>, %18, %cst_6 [2] : vector<1x8x8xf32> to vector<1x8xf32>
    %20 = vector.shape_cast %19 : vector<1x8xf32> to vector<1x8x1xf32>
    %21 = tpu.reciprocal %20 {approx = true} : vector<1x8x1xf32> -> vector<1x8x1xf32>
    %22 = arith.mulf %20, %21 : vector<1x8x1xf32>
    %cst_7 = arith.constant 2.000000e+00 : f32
    %23 = vector.broadcast %cst_7 : f32 to vector<1x8x1xf32>
    %24 = arith.subf %23, %22 : vector<1x8x1xf32>
    %25 = arith.mulf %21, %24 : vector<1x8x1xf32>
    %26 = vector.broadcast %25 : vector<1x8x1xf32> to vector<1x8x8xf32>
    %27 = arith.mulf %18, %26 : vector<1x8x8xf32>
    %c0_8 = arith.constant 0 : index
    %c0_9 = arith.constant 0 : index
    %c0_10 = arith.constant 0 : index
    %c0_11 = arith.constant 0 : index
    %28 = vector.load %arg6[%c0_8, %c0_9, %c0_10, %c0_11] : memref<1x4x8x8xf32, #tpu.memory_space<vmem>>, vector<1x1x8x8xf32>
    %29 = vector.shape_cast %28 : vector<1x1x8x8xf32> to vector<1x8x8xf32>
    %30 = vector.shape_cast %27 : vector<1x8x8xf32> to vector<1x1x8x8xf32>
    tpu.vector_store %arg6[%c0_8, %c0_9, %c0_10, %c0_11], %30 {strides = array<i32>} : memref<1x4x8x8xf32, #tpu.memory_space<vmem>>, vector<1x1x8x8xf32>,
    "tpu.trace_start"() <{level = 10 : i32, message = "bqk,bkd->bqd"}> : () -> ()
    %cst_12 = arith.constant dense<0.000000e+00> : vector<1x8x8xf32>
    %31 = tpu.matmul %27, %12, %cst_12 {dimension_numbers = #tpu.dot_dimension_numbers<[2], [1], [1], [2], [0, 0, 0, 1, 1, 2], [0], [0]>} : vector<1x8x8xf32>, vector<1x8x8xf32>, vector<1x8x8xf32> -> vector<1x8x8xf32>
    "tpu.trace_stop"() : () -> ()
    %c0_13 = arith.constant 0 : index
    %c0_14 = arith.constant 0 : index
    %c0_15 = arith.constant 0 : index
    %32 = vector.load %arg7[%c0_13, %c0_14, %c0_15] : memref<1x8x32xf32, #tpu.memory_space<vmem>>, vector<1x8x8xf32>
    tpu.vector_store %arg7[%c0_13, %c0_14, %c0_15], %31 {strides = array<i32>} : memref<1x8x32xf32, #tpu.memory_space<vmem>>, vector<1x8x8xf32>,
    %33 = vector.extract_strided_slice %4 {offsets = [0, 8], sizes = [8, 8], strides = [1, 1]} : vector<8x32xf32> to vector<8x8xf32>
    %34 = vector.shape_cast %33 : vector<8x8xf32> to vector<1x8x8xf32>
    %35 = vector.extract_strided_slice %5 {offsets = [0, 8], sizes = [8, 8], strides = [1, 1]} : vector<8x32xf32> to vector<8x8xf32>
    %36 = vector.shape_cast %35 : vector<8x8xf32> to vector<1x8x8xf32>
    %37 = vector.extract_strided_slice %6 {offsets = [0, 8], sizes = [8, 8], strides = [1, 1]} : vector<8x32xf32> to vector<8x8xf32>
    %38 = vector.shape_cast %37 : vector<8x8xf32> to vector<1x8x8xf32>
    "tpu.trace_start"() <{level = 10 : i32, message = "bqd,bkd->bqk"}> : () -> ()
    %cst_16 = arith.constant dense<0.000000e+00> : vector<1x8x8xf32>
    %39 = tpu.matmul %34, %36, %cst_16 {dimension_numbers = #tpu.dot_dimension_numbers<[2], [2], [1], [1], [0, 0, 0, 1, 1, 1], [0], [0]>} : vector<1x8x8xf32>, vector<1x8x8xf32>, vector<1x8x8xf32> -> vector<1x8x8xf32>
    "tpu.trace_stop"() : () -> ()
    %cst_17 = arith.constant dense<0xFF800000> : vector<1x8xf32>
    %40 = vector.multi_reduction <maximumf>, %39, %cst_17 [2] : vector<1x8x8xf32> to vector<1x8xf32>
    %41 = vector.shape_cast %40 : vector<1x8xf32> to vector<1x8x1xf32>
    %42 = vector.broadcast %41 : vector<1x8x1xf32> to vector<1x8x8xf32>
    %43 = arith.subf %39, %42 : vector<1x8x8xf32>
    %44 = math.exp %43 : vector<1x8x8xf32>
    %cst_18 = arith.constant dense<0.000000e+00> : vector<1x8xf32>
    %45 = vector.multi_reduction <add>, %44, %cst_18 [2] : vector<1x8x8xf32> to vector<1x8xf32>
    %46 = vector.shape_cast %45 : vector<1x8xf32> to vector<1x8x1xf32>
    %47 = tpu.reciprocal %46 {approx = true} : vector<1x8x1xf32> -> vector<1x8x1xf32>
    %48 = arith.mulf %46, %47 : vector<1x8x1xf32>
    %cst_19 = arith.constant 2.000000e+00 : f32
    %49 = vector.broadcast %cst_19 : f32 to vector<1x8x1xf32>
    %50 = arith.subf %49, %48 : vector<1x8x1xf32>
    %51 = arith.mulf %47, %50 : vector<1x8x1xf32>
    %52 = vector.broadcast %51 : vector<1x8x1xf32> to vector<1x8x8xf32>
    %53 = arith.mulf %44, %52 : vector<1x8x8xf32>
    %c0_20 = arith.constant 0 : index
    %c1 = arith.constant 1 : index
    %c0_21 = arith.constant 0 : index
    %c0_22 = arith.constant 0 : index
    %54 = vector.load %arg6[%c0_20, %c1, %c0_21, %c0_22] : memref<1x4x8x8xf32, #tpu.memory_space<vmem>>, vector<1x1x8x8xf32>
    %55 = vector.shape_cast %54 : vector<1x1x8x8xf32> to vector<1x8x8xf32>
    %56 = vector.shape_cast %53 : vector<1x8x8xf32> to vector<1x1x8x8xf32>
    tpu.vector_store %arg6[%c0_20, %c1, %c0_21, %c0_22], %56 {strides = array<i32>} : memref<1x4x8x8xf32, #tpu.memory_space<vmem>>, vector<1x1x8x8xf32>,
    "tpu.trace_start"() <{level = 10 : i32, message = "bqk,bkd->bqd"}> : () -> ()
    %cst_23 = arith.constant dense<0.000000e+00> : vector<1x8x8xf32>
    %57 = tpu.matmul %53, %38, %cst_23 {dimension_numbers = #tpu.dot_dimension_numbers<[2], [1], [1], [2], [0, 0, 0, 1, 1, 2], [0], [0]>} : vector<1x8x8xf32>, vector<1x8x8xf32>, vector<1x8x8xf32> -> vector<1x8x8xf32>
    "tpu.trace_stop"() : () -> ()
    %c0_24 = arith.constant 0 : index
    %c0_25 = arith.constant 0 : index
    %c8 = arith.constant 8 : index
    %58 = vector.load %arg7[%c0_24, %c0_25, %c8] : memref<1x8x32xf32, #tpu.memory_space<vmem>>, vector<1x8x8xf32>
    tpu.vector_store %arg7[%c0_24, %c0_25, %c8], %57 {strides = array<i32>} : memref<1x8x32xf32, #tpu.memory_space<vmem>>, vector<1x8x8xf32>,
    %59 = vector.extract_strided_slice %4 {offsets = [0, 16], sizes = [8, 8], strides = [1, 1]} : vector<8x32xf32> to vector<8x8xf32>
    %60 = vector.shape_cast %59 : vector<8x8xf32> to vector<1x8x8xf32>
    %61 = vector.extract_strided_slice %5 {offsets = [0, 16], sizes = [8, 8], strides = [1, 1]} : vector<8x32xf32> to vector<8x8xf32>
    %62 = vector.shape_cast %61 : vector<8x8xf32> to vector<1x8x8xf32>
    %63 = vector.extract_strided_slice %6 {offsets = [0, 16], sizes = [8, 8], strides = [1, 1]} : vector<8x32xf32> to vector<8x8xf32>
    %64 = vector.shape_cast %63 : vector<8x8xf32> to vector<1x8x8xf32>
    "tpu.trace_start"() <{level = 10 : i32, message = "bqd,bkd->bqk"}> : () -> ()
    %cst_26 = arith.constant dense<0.000000e+00> : vector<1x8x8xf32>
    %65 = tpu.matmul %60, %62, %cst_26 {dimension_numbers = #tpu.dot_dimension_numbers<[2], [2], [1], [1], [0, 0, 0, 1, 1, 1], [0], [0]>} : vector<1x8x8xf32>, vector<1x8x8xf32>, vector<1x8x8xf32> -> vector<1x8x8xf32>
    "tpu.trace_stop"() : () -> ()
    %cst_27 = arith.constant dense<0xFF800000> : vector<1x8xf32>
    %66 = vector.multi_reduction <maximumf>, %65, %cst_27 [2] : vector<1x8x8xf32> to vector<1x8xf32>
    %67 = vector.shape_cast %66 : vector<1x8xf32> to vector<1x8x1xf32>
    %68 = vector.broadcast %67 : vector<1x8x1xf32> to vector<1x8x8xf32>
    %69 = arith.subf %65, %68 : vector<1x8x8xf32>
    %70 = math.exp %69 : vector<1x8x8xf32>
    %cst_28 = arith.constant dense<0.000000e+00> : vector<1x8xf32>
    %71 = vector.multi_reduction <add>, %70, %cst_28 [2] : vector<1x8x8xf32> to vector<1x8xf32>
    %72 = vector.shape_cast %71 : vector<1x8xf32> to vector<1x8x1xf32>
    %73 = tpu.reciprocal %72 {approx = true} : vector<1x8x1xf32> -> vector<1x8x1xf32>
    %74 = arith.mulf %72, %73 : vector<1x8x1xf32>
    %cst_29 = arith.constant 2.000000e+00 : f32
    %75 = vector.broadcast %cst_29 : f32 to vector<1x8x1xf32>
    %76 = arith.subf %75, %74 : vector<1x8x1xf32>
    %77 = arith.mulf %73, %76 : vector<1x8x1xf32>
    %78 = vector.broadcast %77 : vector<1x8x1xf32> to vector<1x8x8xf32>
    %79 = arith.mulf %70, %78 : vector<1x8x8xf32>
    %c0_30 = arith.constant 0 : index
    %c2 = arith.constant 2 : index
    %c0_31 = arith.constant 0 : index
    %c0_32 = arith.constant 0 : index
    %80 = vector.load %arg6[%c0_30, %c2, %c0_31, %c0_32] : memref<1x4x8x8xf32, #tpu.memory_space<vmem>>, vector<1x1x8x8xf32>
    %81 = vector.shape_cast %80 : vector<1x1x8x8xf32> to vector<1x8x8xf32>
    %82 = vector.shape_cast %79 : vector<1x8x8xf32> to vector<1x1x8x8xf32>
    tpu.vector_store %arg6[%c0_30, %c2, %c0_31, %c0_32], %82 {strides = array<i32>} : memref<1x4x8x8xf32, #tpu.memory_space<vmem>>, vector<1x1x8x8xf32>,
    "tpu.trace_start"() <{level = 10 : i32, message = "bqk,bkd->bqd"}> : () -> ()
    %cst_33 = arith.constant dense<0.000000e+00> : vector<1x8x8xf32>
    %83 = tpu.matmul %79, %64, %cst_33 {dimension_numbers = #tpu.dot_dimension_numbers<[2], [1], [1], [2], [0, 0, 0, 1, 1, 2], [0], [0]>} : vector<1x8x8xf32>, vector<1x8x8xf32>, vector<1x8x8xf32> -> vector<1x8x8xf32>
    "tpu.trace_stop"() : () -> ()
    %c0_34 = arith.constant 0 : index
    %c0_35 = arith.constant 0 : index
    %c16 = arith.constant 16 : index
    %84 = vector.load %arg7[%c0_34, %c0_35, %c16] : memref<1x8x32xf32, #tpu.memory_space<vmem>>, vector<1x8x8xf32>
    tpu.vector_store %arg7[%c0_34, %c0_35, %c16], %83 {strides = array<i32>} : memref<1x8x32xf32, #tpu.memory_space<vmem>>, vector<1x8x8xf32>,
    %85 = vector.extract_strided_slice %4 {offsets = [0, 24], sizes = [8, 8], strides = [1, 1]} : vector<8x32xf32> to vector<8x8xf32>
    %86 = vector.shape_cast %85 : vector<8x8xf32> to vector<1x8x8xf32>
    %87 = vector.extract_strided_slice %5 {offsets = [0, 24], sizes = [8, 8], strides = [1, 1]} : vector<8x32xf32> to vector<8x8xf32>
    %88 = vector.shape_cast %87 : vector<8x8xf32> to vector<1x8x8xf32>
    %89 = vector.extract_strided_slice %6 {offsets = [0, 24], sizes = [8, 8], strides = [1, 1]} : vector<8x32xf32> to vector<8x8xf32>
    %90 = vector.shape_cast %89 : vector<8x8xf32> to vector<1x8x8xf32>
    "tpu.trace_start"() <{level = 10 : i32, message = "bqd,bkd->bqk"}> : () -> ()
    %cst_36 = arith.constant dense<0.000000e+00> : vector<1x8x8xf32>
    %91 = tpu.matmul %86, %88, %cst_36 {dimension_numbers = #tpu.dot_dimension_numbers<[2], [2], [1], [1], [0, 0, 0, 1, 1, 1], [0], [0]>} : vector<1x8x8xf32>, vector<1x8x8xf32>, vector<1x8x8xf32> -> vector<1x8x8xf32>
    "tpu.trace_stop"() : () -> ()
    %cst_37 = arith.constant dense<0xFF800000> : vector<1x8xf32>
    %92 = vector.multi_reduction <maximumf>, %91, %cst_37 [2] : vector<1x8x8xf32> to vector<1x8xf32>
    %93 = vector.shape_cast %92 : vector<1x8xf32> to vector<1x8x1xf32>
    %94 = vector.broadcast %93 : vector<1x8x1xf32> to vector<1x8x8xf32>
    %95 = arith.subf %91, %94 : vector<1x8x8xf32>
    %96 = math.exp %95 : vector<1x8x8xf32>
    %cst_38 = arith.constant dense<0.000000e+00> : vector<1x8xf32>
    %97 = vector.multi_reduction <add>, %96, %cst_38 [2] : vector<1x8x8xf32> to vector<1x8xf32>
    %98 = vector.shape_cast %97 : vector<1x8xf32> to vector<1x8x1xf32>
    %99 = tpu.reciprocal %98 {approx = true} : vector<1x8x1xf32> -> vector<1x8x1xf32>
    %100 = arith.mulf %98, %99 : vector<1x8x1xf32>
    %cst_39 = arith.constant 2.000000e+00 : f32
    %101 = vector.broadcast %cst_39 : f32 to vector<1x8x1xf32>
    %102 = arith.subf %101, %100 : vector<1x8x1xf32>
    %103 = arith.mulf %99, %102 : vector<1x8x1xf32>
    %104 = vector.broadcast %103 : vector<1x8x1xf32> to vector<1x8x8xf32>
    %105 = arith.mulf %96, %104 : vector<1x8x8xf32>
    %c0_40 = arith.constant 0 : index
    %c3 = arith.constant 3 : index
    %c0_41 = arith.constant 0 : index
    %c0_42 = arith.constant 0 : index
    %106 = vector.load %arg6[%c0_40, %c3, %c0_41, %c0_42] : memref<1x4x8x8xf32, #tpu.memory_space<vmem>>, vector<1x1x8x8xf32>
    %107 = vector.shape_cast %106 : vector<1x1x8x8xf32> to vector<1x8x8xf32>
    %108 = vector.shape_cast %105 : vector<1x8x8xf32> to vector<1x1x8x8xf32>
    tpu.vector_store %arg6[%c0_40, %c3, %c0_41, %c0_42], %108 {strides = array<i32>} : memref<1x4x8x8xf32, #tpu.memory_space<vmem>>, vector<1x1x8x8xf32>,
    "tpu.trace_start"() <{level = 10 : i32, message = "bqk,bkd->bqd"}> : () -> ()
    %cst_43 = arith.constant dense<0.000000e+00> : vector<1x8x8xf32>
    %109 = tpu.matmul %105, %90, %cst_43 {dimension_numbers = #tpu.dot_dimension_numbers<[2], [1], [1], [2], [0, 0, 0, 1, 1, 2], [0], [0]>} : vector<1x8x8xf32>, vector<1x8x8xf32>, vector<1x8x8xf32> -> vector<1x8x8xf32>
    "tpu.trace_stop"() : () -> ()
    %c0_44 = arith.constant 0 : index
    %c0_45 = arith.constant 0 : index
    %c24 = arith.constant 24 : index
    %110 = vector.load %arg7[%c0_44, %c0_45, %c24] : memref<1x8x32xf32, #tpu.memory_space<vmem>>, vector<1x8x8xf32>
    tpu.vector_store %arg7[%c0_44, %c0_45, %c24], %109 {strides = array<i32>} : memref<1x8x32xf32, #tpu.memory_space<vmem>>, vector<1x8x8xf32>,
    %c0_46 = arith.constant 0 : index
    %c0_47 = arith.constant 0 : index
    %c0_48 = arith.constant 0 : index
    %111 = vector.load %arg7[%c0_46, %c0_47, %c0_48] : memref<1x8x32xf32, #tpu.memory_space<vmem>>, vector<1x8x32xf32>
    %112 = vector.shape_cast %111 : vector<1x8x32xf32> to vector<8x32xf32>
    %c0_49 = arith.constant 0 : index
    %c0_50 = arith.constant 0 : index
    %113 = vector.load %arg3[%c0_49, %c0_50] : memref<32x32xf32, #tpu.memory_space<vmem>>, vector<32x32xf32>
    %cst_51 = arith.constant dense<0.000000e+00> : vector<8x32xf32>
    %114 = tpu.matmul %112, %113, %cst_51 {dimension_numbers = #tpu.dot_dimension_numbers<[1], [0], [0], [1], [0, 0, 1, 1], [], []>} : vector<8x32xf32>, vector<32x32xf32>, vector<8x32xf32> -> vector<8x32xf32>
    %c0_52 = arith.constant 0 : index
    %c0_53 = arith.constant 0 : index
    %115 = vector.load %arg4[%c0_52, %c0_53] : memref<1x32xf32, #tpu.memory_space<vmem>>, vector<1x32xf32>
    %116 = vector.broadcast %115 : vector<1x32xf32> to vector<8x32xf32>
    %117 = arith.addf %114, %116 : vector<8x32xf32>
    %118 = vector.shape_cast %117 : vector<8x32xf32> to vector<1x8x32xf32>
    %c0_54 = arith.constant 0 : index
    %c0_55 = arith.constant 0 : index
    %c0_56 = arith.constant 0 : index
    %119 = vector.load %arg5[%c0_54, %c0_55, %c0_56] : memref<1x8x32xf32, #tpu.memory_space<vmem>>, vector<1x8x32xf32>
    tpu.vector_store %arg5[%c0_54, %c0_55, %c0_56], %118 {strides = array<i32>} : memref<1x8x32xf32, #tpu.memory_space<vmem>>, vector<1x8x32xf32>,
    return
  }
  func.func @transform_0(%arg0: i32) -> (i32, i32, i32) {
    %c0_i32 = arith.constant 0 : i32
    %c0_i32_0 = arith.constant 0 : i32
    %c0_i32_1 = arith.constant 0 : i32
    return %arg0, %c0_i32, %c0_i32_0 : i32, i32, i32
  }
  func.func @transform_1(%arg0: i32) -> (i32, i32) {
    %c0_i32 = arith.constant 0 : i32
    %c0_i32_0 = arith.constant 0 : i32
    %c0_i32_1 = arith.constant 0 : i32
    return %c0_i32, %c0_i32_0 : i32, i32
  }
  func.func @transform_2(%arg0: i32) -> (i32, i32) {
    %c0_i32 = arith.constant 0 : i32
    %c0_i32_0 = arith.constant 0 : i32
    %c0_i32_1 = arith.constant 0 : i32
    return %c0_i32, %c0_i32_0 : i32, i32
  }
  func.func @transform_3(%arg0: i32) -> (i32, i32) {
    %c0_i32 = arith.constant 0 : i32
    %c0_i32_0 = arith.constant 0 : i32
    %c0_i32_1 = arith.constant 0 : i32
    return %c0_i32, %c0_i32_0 : i32, i32
  }
  func.func @transform_4(%arg0: i32) -> (i32, i32, i32) {
    %c0_i32 = arith.constant 0 : i32
    %c0_i32_0 = arith.constant 0 : i32
    %c0_i32_1 = arith.constant 0 : i32
    return %arg0, %c0_i32, %c0_i32_0 : i32, i32, i32
  }
  func.func @transform_5(%arg0: i32) -> (i32, i32, i32, i32) {
    %c0_i32 = arith.constant 0 : i32
    %c0_i32_0 = arith.constant 0 : i32
    %c0_i32_1 = arith.constant 0 : i32
    %c0_i32_2 = arith.constant 0 : i32
    return %arg0, %c0_i32, %c0_i32_0, %c0_i32_1 : i32, i32, i32, i32
  }
}

</mosaic_0001>

<bundles_post_ra>
// kernel: tpu_custom_call.1
= control target key start
LH: loop header
LB: loop body
LE: loop exit
PB: predicated region body
PF: predicated region fallthrough
CT: control target
= control target key end

     0   :  { %11 = vsyncpa [#allocation4], 0  ;;  %s2064_s0 = inlined_call_operand.hbm [shape: f32[2,8,32], index: 0, kind: input, shape index: {}]   ;;  %s2065_s1 = inlined_call_operand.hbm [shape: f32[32,96], index: 1, kind: input, shape index: {}]   ;;  %s2066_s2 = inlined_call_operand.hbm [shape: f32[32,32], index: 2, kind: input, shape index: {}]   ;;  %s2067_s3 = inlined_call_operand.vmem [shape: f32[1,32], index: 3, kind: input, shape index: {}]   ;;  %s2068_s4 = inlined_call_operand.hbm [shape: f32[2,8,32], index: 4, kind: output, shape index: {0}]   ;;  %s2069_s5 = inlined_call_operand.hbm [shape: f32[2,4,8,8], index: 5, kind: output, shape index: {1}]  }
   0x1   :  { %13 = vsyncpa [#allocation4 + $0x1], 0 }
   0x2   :  { %14 = vsyncpa [#allocation7], 0 }
   0x3   :  { %15 = vsyncpa [#allocation5], 0 }
   0x4   :  { %17 = vsyncpa [#allocation5 + $0x1], 0 }
   0x5   :  { %18 = vsyncpa [#allocation11], 0 }
   0x6   :  { %20 = vsyncpa [#allocation11 + $0x1], 0  ;;  %s1767_s18 = smov 0   ;;  %s1769_s19 = smov 0  }
   0x7   :  { %s1771_s20 = smov 0   ;;  %s1773_s21 = smov 0  }
   0x8 LB: > { %s1788_s22 = sadd.s32 4294967295, %s1711_s21   ;;  %s1299_s23 = sadd.s32 4294967294, %s1711_s21   ;;  %s1711_s21 = sphi %s1773_s21, %s2091_s21   ;;  %s1707_s20 = sphi %s1771_s20, %s2090_s20   ;;  %s1703_s19 = sphi %s1769_s19, %s2089_s19   ;;  %s1699_s18 = sphi %s1767_s18, %s2088_s18  }
   0x9   : > { %p46_p0 = scmp.ne.s32.totalorder %s1703_s19, %s1699_s18  ;;  %p2070_p1 = scmp.eq.s32.totalorder %s1788_s22, 0 }
   0xa   : > { %p139_p3 = scmp.eq.s32.totalorder %s1299_s23, 1  ;;  %p1300_p5 = scmp.ge.s32.totalorder %s1711_s21, 1 }
   0xb   : > { %p1797_p4 = por %p2070_p1, %p46_p0  ;;  %p172_p7 = scmp.lt.s32.totalorder %s1711_s21, 3 }
   0xc   : > { %p1802_p6 = por %p139_p3, %p46_p0  ;;  %s1713_s27 = smov [#allocation6]  }
   0xd   : > { %s2074_s24 = scalar_select %p1797_p4, 1, 0 }
   0xe   : > { %s2075_s25 = scalar_select %p1802_p6, 1, 0 }
   0xf   : > { %p1807_p8 = pnand %p1300_p5, %p172_p7  ;;  %s184_s28 = sshll.u32 %s1713_s27, 4  ;;  %s185_s28 = int_to_ptr.vmem [resolvable:$true] %s184_s28 }
  0x10   : > { %s1714_s30 = smov [#allocation8]   ;;  %s1544_s7 = scalar_lea.vmem %s185_s28, 512 }
  0x11   : > { %s2076_s26 = scalar_select %p1807_p8, 1, 0 }
  0x12   : > { %p1440_p9 = pneg %p1807_p8  ;;  %s197_s6 = sshll.u32 %s1714_s30, 4  ;;  %s198_s6 = int_to_ptr.vmem [resolvable:$true] %s197_s6 }
  0x13   : > { %p1545_p13 = scmp.ne.s32.totalorder %s185_s28, %s1544_s7  ;;  %p1552_p5 = scmp.lt.s32.totalorder %s185_s28, %s185_s28 }
  0x14   : > { %p1816_p11 = pnand %p1440_p9, %p2070_p1  ;;  %p1553_p7 = scmp.lt.s32.totalorder %s1544_s7, %s1544_s7 }
  0x16   : > { %p1535_p12 = pneg %p1816_p11  ;;  %p1554_p10 = por %p1553_p7, %p1552_p5 }
  0x18   : > { %p1547_p0 = pnand %p1545_p13, %p1535_p12 }
  0x1a   : > { %p1548_p3 = pneg %p1547_p0 }
  0x1c   : > { %p1555_p9 = pnand %p1554_p10, %p1548_p3 }
  0x1e   : > { %1558 = shalt.err (!%p1555_p9)
}
  0x1f   : > { %s1715_s8 = smov 128   ;;  %s1716_s9 = smov 8  }
  0x20   : > { %1443 = dma.hbm_to_vmem [thread:$0]  (!%p1816_p11), %s2065_s1, 512, %s185_s28, [#allocation7], %s1715_s8, %s1715_s8, %s1716_s9  }
  0x21   : > { %s1570_s12 = scalar_lea.vmem %s198_s6, 512  ;;  %p1578_p2 = scmp.lt.s32.totalorder %s198_s6, %s198_s6 }
  0x22   : > { %p1571_p1 = scmp.ne.s32.totalorder %s198_s6, %s1570_s12  ;;  %p1579_p6 = scmp.lt.s32.totalorder %s1570_s12, %s1570_s12 }
  0x24   : > { %p1573_p13 = pnand %p1571_p1, %p1535_p12  ;;  %p1580_p5 = por %p1579_p6, %p1578_p2 }
  0x26   : > { %p1574_p0 = pneg %p1573_p13 }
  0x28   : > { %p1581_p10 = pnand %p1580_p5, %p1574_p0 }
  0x2a   : > { %1584 = shalt.err (!%p1581_p10)
}
  0x2b   : > { %1446 = dma.hbm_to_vmem [thread:$0]  (!%p1816_p11), %s2066_s2, 512, %s198_s6, [#allocation7], %s1715_s8, %s1715_s8, %s1716_s9  }
  0x2c   : > { %s1839_s15 = sadd.s32 1, %s1711_s21   ;;  %s33_s16 = sadd.s32 1, %s1707_s20 }
  0x2d   : > { %s30_s17 = ssub.s32 %s1711_s21, %s1839_s15  ;;  %p40_p1 = scmp.ne.s32.totalorder %s1707_s20, %s1703_s19 }
  0x2e   : > { %p31_p2 = scmp.eq.s32.totalorder %s30_s17, 0  ;;  %p41_p6 = scmp.eq.s32.totalorder %s1711_s21, 0 }
  0x2f   : > { %p2078_p12 = scmp.eq.s32.totalorder %s1788_s22, 1  ;;  %p1460_p7 = scmp.lt.s32.totalorder %s1711_s21, 2 }
  0x30   : > { %s1855_s27 = scalar_select %p31_p2, %s1707_s20, %s33_s16  }
  0x31   : > { %p1849_p3 = por %p2078_p12, %p40_p1  ;;  %p42_p9 = por %p41_p6, %p40_p1 }
  0x32   : > { %s214_s28 = sand.u32 1, %s1707_s20   ;;  %s1305_s30 = sshll.u32 %s1711_s21, 7 }
  0x33   : > { %s2079_s23 = scalar_select %p1849_p3, 1, 0 }
  0x34   : > { %s1304_s29 = sshll.u32 %s214_s28, 3  ;;  %s1862_s8 = scalar_lea.hbm %s2064_s0, %s1305_s30 }
  0x35   : > { %s218_s9 = scalar_lea.vmem [#allocation3], %s1304_s29  ;;  %p1864_p11 = pnand %p1460_p7, %p42_p9 }
  0x36   : > { %s225_s10 = sshll.u32 %s218_s9, 4  ;;  %s215_s12 = scalar_lea.sflag [#allocation4], %s214_s28  ;;  %s226_s10 = int_to_ptr.vmem [resolvable:$true] %s225_s10 }
  0x37   : > { %s1585_s13 = scalar_lea.hbm %s1862_s8, 128  ;;  %p1587_p0 = pneg %p1864_p11 }
  0x38   : > { %p1586_p13 = scmp.ne.s32.totalorder %s1862_s8, %s1585_s13  ;;  %s1590_s17 = scalar_lea.hbm %s2064_s0, 256 }
  0x39   : > { %p1591_p1 = scmp.lt.s32.totalorder %s1862_s8, %s2064_s0  ;;  %p1592_p2 = scmp.lt.s32.totalorder %s1590_s17, %s1585_s13 }
  0x3a   : > { %p1588_p5 = pnand %p1587_p0, %p1586_p13 }
  0x3b   : > { %p1593_p6 = por %p1592_p2, %p1591_p1 }
  0x3c   : > { %p1589_p10 = pneg %p1588_p5 }
  0x3e   : > { %p1594_p12 = pnand %p1593_p6, %p1589_p10 }
  0x40   : > { %1597 = shalt.err (!%p1594_p12)
}
  0x41   : > { %s1598_s6 = scalar_lea.vmem %s226_s10, 128  ;;  %s1717_s28 = smov [#allocation3]  }
  0x42   : > { %p1599_p7 = scmp.ne.s32.totalorder %s226_s10, %s1598_s6  ;;  %s1603_s7 = sshll.u32 %s1717_s28, 4  ;;  %s1604_s7 = int_to_ptr.vmem [resolvable:$false] %s1603_s7 }
  0x43   : > { %s1605_s9 = scalar_lea.vmem %s1604_s7, 256  ;;  %p1606_p13 = scmp.lt.s32.totalorder %s226_s10, %s1604_s7 }
  0x44   : > { %p1601_p9 = pnand %p1599_p7, %p1587_p0  ;;  %p1607_p5 = scmp.lt.s32.totalorder %s1605_s9, %s1598_s6 }
  0x46   : > { %p1602_p3 = pneg %p1601_p9  ;;  %p1608_p4 = por %p1607_p5, %p1606_p13 }
  0x48   : > { %p1609_p8 = pnand %p1608_p4, %p1602_p3 }
  0x4a   : > { %1612 = shalt.err (!%p1609_p8)
}
  0x4b   : > { %1450 = dma.hbm_to_vmem [thread:$0]  (!%p1864_p11), %s1862_s8, 128, %s226_s10, %s215_s12  }
  0x4c   : > { %p2081_p10 = scmp.ne.s32.totalorder %s2076_s26, 0 }
  0x4d   : > { %s1885_s13 = sand.u32 (!%p2081_p10), 1, %s1703_s19   ;;  %p2082_p4 = scmp.ne.s32.totalorder (!%p2081_p10), %s2074_s24, 0 }
  0x4e   : > { %234 = sbr.rel (%p2081_p10) target bundleno = 1966 (0x7ae), region = 36  ;;  %s1307_s14 = sshll.u32 (!%p2081_p10), %s1885_s13, 3 }
  0x4f   : > { %s237_s16 = scalar_lea.sflag (!%p2081_p10), [#allocation4], %s1885_s13  ;;  %s240_s17 = scalar_lea.vmem (!%p2081_p10), [#allocation3], %s1307_s14 }
  0x53   : > { %1682 = dma.done.wait (%p2082_p4), %s237_s16, 128  }
  0x54   : > { %1684 = vsyncadd (%p2082_p4), %s237_s16, 4294967168  ;;  %p2083_p8 = scmp.eq.s32.totalorder %s1788_s22, 0 }
  0x56   : > { %1686 = dma.done.wait (%p2083_p8), [#allocation7], 1024   ;;  %p2084_p3 = pmov %p2083_p8 }
  0x57   : > { %v1718_v0 = vmov 0.0   ;;  %vm1719_vm0 = vmmov 0   ;;  %v284_v1 = vld [vmem:[#allocation6 + $0x18] sm:$0xff]  ;;  %v283_v2 = vld [vmem:[#allocation6 + $0x10] sm:$0xff]  ;;  %v282_v3 = vld [vmem:[#allocation6 + $0x8] sm:$0xff]  ;;  %vm285_vm1 = vcmask 261120  }
  0x58   : > { %1688 = vsyncadd (%p2084_p3), [#allocation7], 4294966272  ;;  %1364 = vmatprep.subr.mxu0 %v1718_v0  ;;  %1372 = vmatprep.mubr.msk.f32.mxu0 %vm1719_vm0, %v1718_v0  ;;  %v281_v4 = vld [vmem:[#allocation6] sm:$0xff]  ;;  %v280_v5 = vld [vmem:[%s240_s17] sm:$0xff]  ;;  %s1720_s24 = smov 64   ;;  %s1721_s26 = smov 96  }
  0x59   : > { %1375 = vmatprep.subr.mxu1 %v1718_v0  ;;  %1377 = vmatprep.mubr.msk.f32.mxu1 %vm1719_vm0, %v1718_v0  ;;  %s1722_s8 = smov 88   ;;  %vm362_vm2 = vcmask 64512   ;;  %s1723_s10 = smov 72   ;;  %vm703_vm3 = vcmask 130112   ;;  %vm879_vm4 = vcmask 195712   ;;  %vm1055_vm5 = vcmask 261312  }
  0x5a   : > { %1365 = vmatpush3.msra.mxu0 %v284_v1  ;;  %s1724_s11 = smov 120   ;;  %s1725_s12 = smov 80  }
  0x5b   : > { %1366 = vmatprep.subr.mxu0 %v1718_v0  ;;  %s1726_s30 = smov 112   ;;  %s1727_s29 = smov 104  }
  0x5c   : > { %1367 = vmatpush3.msra.mxu0 %v283_v2  ;;  %s1311_s6 = sshll.u32 %s1885_s13, 5  ;;  %s1728_s7 = smov 56  }
  0x5d   : > { %1368 = vmatprep.subr.mxu0 %v1718_v0  ;;  %s1942_s28 = scalar_lea.vmem [#allocation10], %s1311_s6  ;;  %s1729_s9 = smov 40  }
  0x5e   : > { %1369 = vmatpush3.msra.mxu0 %v282_v3  ;;  %s1730_s16 = smov 48   ;;  %s1731_s17 = smov 8  }
  0x5f   : > { %1370 = vmatprep.subr.mxu0 %v1718_v0  ;;  %p2085_p0 = scmp.ne.s32.totalorder %s2079_s23, 0 }
  0x60   : > { %1371 = vmatpush3.msra.mxu0 %v281_v4 }
  0x61   : > { %1373 = vmatmul.mubr.msk.f32.vlgmr.msra.gmra.mxu0 %vm285_vm1, %v280_v5  ;;  %1395 = vmatprep.subr.mxu0 %v1718_v0 }
  0x62   : > { %1397 = vmatprep.mubr.msk.f32.mxu0 %vm1719_vm0, %v1718_v0 }
 0x121   : > { %v1912_v6 = vpop.f32.mrf.mxu0 }
 0x122   : > { %452 = vrot.lane.b32.xlu1 %v1912_v6, %s1720_s24  ;;  %360 = vrot.lane.b32.xlu0 %v1912_v6, %s1721_s26  ;;  %s1732_s24 = smov 16   ;;  %s1733_s26 = smov 24  }
 0x123   : > { %v1374_v7 = vpop.f32.mrf.mxu0 }
 0x126   : > { %531 = vrot.lane.b32.xlu1 %v1912_v6, %s1722_s8  ;;  %s1337_s8 = sshll.u32 %s1788_s22, 9 }
 0x194   : > { %v361_v8 = vpop.permute.xlu0 %360  ;;  %v453_v9 = vpop.permute.xlu1 %452 }
 0x195   : > { %1376 = vmatpush3.xpose.msk.msra.mxu1 %vm362_vm2, %v361_v8 }
 0x196   : > { %1380 = vmatprep.subr.mxu1 %v1718_v0 }
 0x198   : > { %1378 = vmatmul.mubr.msk.f32.vlgmr.msra.gmra.mxu1 %vm362_vm2, %v1912_v6  ;;  %v532_v18 = vpop.permute.xlu1 %531 }
 0x199   : > { %1381 = vmatpush3.msra.mxu1 %v453_v9  ;;  %1382 = vmatprep.mubr.msk.f32.mxu1 %vm1719_vm0, %v1718_v0 }
 0x19a   : > { %1385 = vmatprep.subr.mxu1 %v1718_v0 }
 0x258   : > { %v433_v10 = vpop.f32.mrf.mxu1 }
 0x259   : > { %v437_v11 = vsel %vm362_vm2, %v433_v10, -inf }
 0x25a   : > { %438 = vmax.xlane.f32.xlu0 %v437_v11  ;;  %v1379_v12 = vpop.f32.mrf.mxu1 }
 0x270   : > { %883 = vrot.lane.b32.xlu0 %v1912_v6, %s1723_s10  ;;  %s1175_s10 = sshll.u32 %s1942_s28, 4  ;;  %s1991_s10 = int_to_ptr.vmem [resolvable:$true] %s1175_s10 }
 0x271   : > { %s1613_s6 = scalar_lea.vmem %s1991_s10, 512 }
 0x272   : > { %p1614_p11 = scmp.ne.s32.totalorder %s1991_s10, %s1613_s6 }
 0x274   : > { %p1615_p1 = pnand %p1614_p11, %p2085_p0 }
 0x276   : > { %p1616_p2 = pneg %p1615_p1 }
 0x2e3   : > { %v439_v13 = vpop.xlane.xlu0 %438 }
 0x2e4   : > { %v440_v14 = vsub.f32 %v433_v10, %v439_v13 }
 0x2e6   : > { %v441_v15 = vmul.f32 1.442695, %v440_v14  ;;  %v1061_v14 = vld [vmem:[#allocation8 + $0x18] sm:$0xff] }
 0x2e7   : > { %v884_v23 = vpop.permute.xlu0 %883 }
 0x2e8   : > { %1517 = vpow2.f32 %v441_v15  ;;  %v1060_v15 = vld [vmem:[#allocation8 + $0x10] sm:$0xff] }
 0x2f5   : > { %v1518_v16 = vpop.eup %1517 }
 0x2f6   : > { %v443_v17 = vsel %vm362_vm2, %v1518_v16, 0.0 }
 0x2f7   : > { %444 = vadd.xlane.f32.xlu1 %v443_v17 }
 0x308   : > { %529 = vrot.lane.b32.xlu1 %v1912_v6, %s1724_s11 }
 0x30c   : > { %707 = vrot.lane.b32.xlu1 %v1912_v6, %s1725_s12 }
 0x310   : > { %705 = vrot.lane.b32.xlu1 %v1912_v6, %s1726_s30  ;;  %s1989_s30 = scalar_lea.hbm %s2069_s5, %s1337_s8 }
 0x314   : > { %881 = vrot.lane.b32.xlu1 %v1912_v6, %s1727_s29  ;;  %s1149_s29 = scalar_lea.sflag [#allocation11], %s1885_s13 }
 0x380   : > { %v445_v19 = vpop.xlane.xlu1 %444 }
 0x381   : > { %1519 = vrcp.f32 %v445_v19 }
 0x384   : > { %v530_v20 = vpop.permute.xlu1 %529 }
 0x388   : > { %v708_v21 = vpop.permute.xlu1 %707 }
 0x389   : > { %1396 = vmatpush3.xpose.msk.msra.mxu0 %vm362_vm2, %v708_v21 }
 0x38a   : > { %1405 = vmatprep.subr.mxu0 %v1718_v0 }
 0x38c   : > { %v706_v22 = vpop.permute.xlu1 %705 }
 0x38d   : > { %1398 = vmatmul.mubr.msk.f32.vlgmr.msra.gmra.mxu0 %vm362_vm2, %v706_v22 }
 0x38e   : > { %v1520_v24 = vpop.eup %1519  ;;  %1406 = vmatpush3.xpose.msk.msra.mxu0 %vm362_vm2, %v884_v23  ;;  %1407 = vmatprep.mubr.msk.f32.mxu0 %vm1719_vm0, %v1718_v0 }
 0x38f   : > { %v447_v25 = vmul.f32 %v1520_v24, %v445_v19  ;;  %1415 = vmatprep.subr.mxu0 %v1718_v0 }
 0x390   : > { %v882_v26 = vpop.permute.xlu1 %881 }
 0x391   : > { %v448_v27 = vsub.f32 2.0, %v447_v25  ;;  %1408 = vmatmul.mubr.msk.f32.vlgmr.msra.gmra.mxu0 %vm362_vm2, %v882_v26 }
 0x392   : > { %1423 = vmatprep.mubr.msk.f32.mxu0 %vm1719_vm0, %v1718_v0  ;;  %1416 = vmatpush3.msra.mxu0 %v1061_v14 }
 0x393   : > { %v449_v28 = vmul.f32 %v1520_v24, %v448_v27  ;;  %1417 = vmatprep.subr.mxu0 %v1718_v0 }
 0x394   : > { %1418 = vmatpush3.msra.mxu0 %v1060_v15 }
 0x395   : > { %v450_v29 = vmul.f32 %v1518_v16, %v449_v28  ;;  %v1059_v16 = vld [vmem:[#allocation8 + $0x8] sm:$0xff]  ;;  %1419 = vmatprep.subr.mxu0 %v1718_v0 }
 0x396   : > { %1420 = vmatpush3.msra.mxu0 %v1059_v16 }
 0x397   : > { %451 = vst.msk [vmem:[%s1942_s28] sm:$0xff] %vm362_vm2, %v450_v29  ;;  %1383 = vmatmul.mubr.msk.f32.vlgmr.msra.gmra.mxu1 %vm362_vm2, %v450_v29  ;;  %1421 = vmatprep.subr.mxu0 %v1718_v0 }
 0x398   : > { %1386 = vmatpush3.xpose.msk.msra.mxu1 %vm362_vm2, %v532_v18  ;;  %1387 = vmatprep.mubr.msk.f32.mxu1 %vm1719_vm0, %v1718_v0  ;;  %v1058_v18 = vld [vmem:[#allocation8] sm:$0xff] }
 0x399   : > { %1390 = vmatprep.subr.mxu1 %v1718_v0  ;;  %1422 = vmatpush3.msra.mxu0 %v1058_v18 }
 0x39b   : > { %1388 = vmatmul.mubr.msk.f32.vlgmr.msra.gmra.mxu1 %vm362_vm2, %v530_v20 }
 0x39c   : > { %1392 = vmatprep.mubr.msk.f32.mxu1 %vm1719_vm0, %v1718_v0 }
 0x44d   : > { %v779_v30 = vpop.f32.mrf.mxu0 }
 0x44e   : > { %v783_v31 = vsel %vm362_vm2, %v779_v30, -inf }
 0x44f   : > { %784 = vmax.xlane.f32.xlu0 %v783_v31  ;;  %v1399_v32 = vpop.f32.mrf.mxu0 }
 0x451   : > { %v955_v33 = vpop.f32.mrf.mxu0 }
 0x452   : > { %v959_v40 = vsel %vm362_vm2, %v955_v33, -inf }
 0x453   : > { %v1409_v34 = vpop.f32.mrf.mxu0 }
 0x457   : > { %v524_v35 = vpop.f32.mrf.mxu1 }
 0x458   : > { %528 = vst.msk [vmem:[#allocation2] sm:$0xff] %vm362_vm2, %v524_v35 }
 0x459   : > { %v1384_v36 = vpop.f32.mrf.mxu1 }
 0x45b   : > { %v603_v37 = vpop.f32.mrf.mxu1 }
 0x45c   : > { %v607_v38 = vsel %vm362_vm2, %v603_v37, -inf }
 0x45d   : > { %608 = vmax.xlane.f32.xlu1 %v607_v38  ;;  %v1389_v39 = vpop.f32.mrf.mxu1 }
 0x461   : > { %960 = vmax.xlane.f32.xlu1 %v959_v40 }
 0x4d8   : > { %v785_v41 = vpop.xlane.xlu0 %784 }
 0x4d9   : > { %v786_v42 = vsub.f32 %v779_v30, %v785_v41 }
 0x4db   : > { %v787_v43 = vmul.f32 1.442695, %v786_v42 }
 0x4dd   : > { %1521 = vpow2.f32 %v787_v43 }
 0x4e6   : > { %v609_v44 = vpop.xlane.xlu1 %608 }
 0x4e7   : > { %v610_v45 = vsub.f32 %v603_v37, %v609_v44 }
 0x4e9   : > { %v611_v46 = vmul.f32 1.442695, %v610_v45 }
 0x4ea   : > { %v1522_v47 = vpop.eup %1521  ;;  %v961_v48 = vpop.xlane.xlu1 %960 }
 0x4eb   : > { %1523 = vpow2.f32 %v611_v46  ;;  %v962_v49 = vsub.f32 %v955_v33, %v961_v48  ;;  %v789_v50 = vsel %vm362_vm2, %v1522_v47, 0.0 }
 0x4ec   : > { %790 = vadd.xlane.f32.xlu1 %v789_v50 }
 0x4ed   : > { %v963_v51 = vmul.f32 1.442695, %v962_v49 }
 0x4ef   : > { %1525 = vpow2.f32 %v963_v51 }
 0x4f8   : > { %v1524_v52 = vpop.eup %1523 }
 0x4f9   : > { %v613_v53 = vsel %vm362_vm2, %v1524_v52, 0.0 }
 0x4fa   : > { %614 = vadd.xlane.f32.xlu1 %v613_v53 }
 0x4fc   : > { %v1526_v54 = vpop.eup %1525 }
 0x4fd   : > { %v965_v55 = vsel %vm362_vm2, %v1526_v54, 0.0 }
 0x4fe   : > { %966 = vadd.xlane.f32.xlu0 %v965_v55 }
 0x50b   : > { %623 = vrot.lane.b32.xlu1 %v1912_v6, %s1728_s7  ;;  %s1734_s7 = smov [#allocation10]  }
 0x50f   : > { %975 = vrot.lane.b32.xlu1 %v1912_v6, %s1729_s9  ;;  %s1617_s9 = sshll.u32 %s1734_s7, 4  ;;  %s1618_s9 = int_to_ptr.vmem [resolvable:$false] %s1617_s9 }
 0x510   : > { %p1620_p6 = scmp.lt.s32.totalorder %s1991_s10, %s1618_s9 }
 0x514   : > { %799 = vrot.lane.b32.xlu0 %v1912_v6, %s1730_s16 }
 0x575   : > { %v791_v56 = vpop.xlane.xlu1 %790 }
 0x576   : > { %1527 = vrcp.f32 %v791_v56 }
 0x583   : > { %v1528_v57 = vpop.eup %1527  ;;  %v615_v58 = vpop.xlane.xlu1 %614 }
 0x584   : > { %v793_v59 = vmul.f32 %v1528_v57, %v791_v56  ;;  %1529 = vrcp.f32 %v615_v58 }
 0x586   : > { %v794_v60 = vsub.f32 2.0, %v793_v59 }
 0x587   : > { %v967_v61 = vpop.xlane.xlu0 %966  ;;  %v624_v62 = vpop.permute.xlu1 %623 }
 0x588   : > { %v795_v63 = vmul.f32 %v1528_v57, %v794_v60  ;;  %1531 = vrcp.f32 %v967_v61  ;;  %1391 = vmatpush3.msra.mxu1 %v624_v62 }
 0x589   : > { %1400 = vmatprep.subr.mxu1 %v1718_v0 }
 0x58a   : > { %v796_v1 = vmul.f32 %v1522_v47, %v795_v63 }
 0x58b   : > { %v800_v11 = vpop.permute.xlu0 %799  ;;  %v976_v13 = vpop.permute.xlu1 %975 }
 0x58c   : > { %1322 = vst.msk [vmem:[%s1942_s28 + $0x10] sm:$0xff] %vm362_vm2, %v796_v1 }
 0x591   : > { %v1530_v2 = vpop.eup %1529 }
 0x592   : > { %v617_v3 = vmul.f32 %v1530_v2, %v615_v58 }
 0x594   : > { %v618_v4 = vsub.f32 2.0, %v617_v3 }
 0x595   : > { %v1532_v5 = vpop.eup %1531 }
 0x596   : > { %v619_v6 = vmul.f32 %v1530_v2, %v618_v4  ;;  %v969_v7 = vmul.f32 %v1532_v5, %v967_v61 }
 0x598   : > { %v620_v8 = vmul.f32 %v1524_v52, %v619_v6  ;;  %v970_v9 = vsub.f32 2.0, %v969_v7 }
 0x59a   : > { %1318 = vst.msk [vmem:[%s1942_s28 + $0x8] sm:$0xff] %vm362_vm2, %v620_v8  ;;  %v971_v10 = vmul.f32 %v1532_v5, %v970_v9  ;;  %1393 = vmatmul.mubr.msk.f32.vlgmr.msra.gmra.mxu1 %vm362_vm2, %v620_v8 }
 0x59b   : > { %1401 = vmatpush3.msra.mxu1 %v800_v11  ;;  %1402 = vmatprep.mubr.msk.f32.mxu1 %vm1719_vm0, %v1718_v0 }
 0x59c   : > { %v972_v12 = vmul.f32 %v1526_v54, %v971_v10  ;;  %1410 = vmatprep.subr.mxu1 %v1718_v0 }
 0x59e   : > { %1326 = vst.msk [vmem:[%s1942_s28 + $0x18] sm:$0xff] %vm362_vm2, %v972_v12  ;;  %1403 = vmatmul.mubr.msk.f32.vlgmr.msra.gmra.mxu1 %vm362_vm2, %v796_v1  ;;  %s1619_s28 = scalar_lea.vmem %s1618_s9, 1024 }
 0x59f   : > { %1411 = vmatpush3.msra.mxu1 %v976_v13  ;;  %1412 = vmatprep.mubr.msk.f32.mxu1 %vm1719_vm0, %v1718_v0  ;;  %p1621_p12 = scmp.lt.s32.totalorder %s1619_s28, %s1613_s6 }
 0x5a1   : > { %p1622_p7 = por %p1621_p12, %p1620_p6 }
 0x5a2   : > { %1413 = vmatmul.mubr.msk.f32.vlgmr.msra.gmra.mxu1 %vm362_vm2, %v972_v12 }
 0x5a3   : > { %p1623_p9 = pnand %p1622_p7, %p1616_p2 }
 0x65a   : > { %v695_v17 = vpop.f32.mrf.mxu1 }
 0x65b   : > { %700 = vrot.lane.b32.xlu1 %v695_v17, %s1731_s17 }
 0x65c   : > { %v1394_v19 = vpop.f32.mrf.mxu1 }
 0x65e   : > { %v871_v20 = vpop.f32.mrf.mxu1 }
 0x65f   : > { %876 = vrot.lane.b32.xlu0 %v871_v20, %s1732_s24 }
 0x660   : > { %v1404_v21 = vpop.f32.mrf.mxu1 }
 0x662   : > { %v1047_v22 = vpop.f32.mrf.mxu1 }
 0x663   : > { %1052 = vrot.lane.b32.xlu1 %v1047_v22, %s1733_s26 }
 0x664   : > { %v1414_v23 = vpop.f32.mrf.mxu1 }
 0x6cd   : > { %v701_v24 = vpop.permute.xlu1 %700 }
 0x6ce   : > { %704 = vst.msk [vmem:[#allocation2] sm:$0xff] %vm703_vm3, %v701_v24 }
 0x6d1   : > { %v877_v25 = vpop.permute.xlu0 %876 }
 0x6d2   : > { %880 = vst.msk [vmem:[#allocation2] sm:$0xff] %vm879_vm4, %v877_v25 }
 0x6d5   : > { %v1053_v0 = vpop.permute.xlu1 %1052 }
 0x6d6   : > { %1056 = vst.msk [vmem:[#allocation2] sm:$0xff] %vm1055_vm5, %v1053_v0 }
 0x6dd   : > { %v1057_v26 = vld [vmem:[#allocation2] sm:$0xff] }
 0x6de   : > { %1424 = vmatmul.mubr.msk.f32.vlgmr.msra.gmra.mxu0 %vm285_vm1, %v1057_v26 }
 0x6df   : > { %1626 = shalt.err (!%p1623_p9)
}
 0x6e0   : > { %s1627_s16 = scalar_lea.hbm %s1989_s30, 512  ;;  %s1631_s8 = scalar_lea.hbm %s2069_s5, 1024 }
 0x6e1   : > { %p1628_p13 = scmp.ne.s32.totalorder %s1989_s30, %s1627_s16  ;;  %p1632_p4 = scmp.lt.s32.totalorder %s1989_s30, %s2069_s5 }
 0x6e2   : > { %p1633_p8 = scmp.lt.s32.totalorder %s1631_s8, %s1627_s16 }
 0x6e3   : > { %p1629_p5 = pnand %p1628_p13, %p2085_p0 }
 0x6e4   : > { %p1634_p3 = por %p1633_p8, %p1632_p4 }
 0x6e5   : > { %p1630_p10 = pneg %p1629_p5 }
 0x6e7   : > { %p1635_p11 = pnand %p1634_p3, %p1630_p10 }
 0x6e9   : > { %1638 = shalt.err (!%p1635_p11)
}
 0x6ea   : > { %s1735_s6 = smov 128   ;;  %v1328_v27 = vld [vmem:[%s2067_s3] ss:$0 sm:$0xff]  ;;  %s1332_s28 = sshll.u32 %s1788_s22, 7 }
 0x6eb   : > { %1437 = dma.vmem_to_hbm [thread:$0]  (%p2085_p0), %s1991_s10, 512, %s1989_s30, %s1149_s29, %s1735_s6, %s1735_s6, %s1731_s17  }
 0x6ec   : > { %s272_s16 = scalar_lea.vmem [#allocation9], %s1307_s14  ;;  %s2026_s11 = scalar_lea.hbm %s2068_s4, %s1332_s28 }
 0x6ed   : > { %s1162_s24 = sshll.u32 %s272_s16, 4  ;;  %s1144_s17 = scalar_lea.sflag [#allocation5], %s1885_s13  ;;  %s1163_s24 = int_to_ptr.vmem [resolvable:$true] %s1162_s24 }
 0x6ee   : > { %s1639_s10 = scalar_lea.vmem %s1163_s24, 128  ;;  %s1736_s22 = smov [#allocation9]  }
 0x6ef   : > { %p1640_p1 = scmp.ne.s32.totalorder %s1163_s24, %s1639_s10  ;;  %s1643_s14 = sshll.u32 %s1736_s22, 4  ;;  %s1644_s14 = int_to_ptr.vmem [resolvable:$false] %s1643_s14 }
 0x6f0   : > { %s1645_s30 = scalar_lea.vmem %s1644_s14, 256  ;;  %p1646_p12 = scmp.lt.s32.totalorder %s1163_s24, %s1644_s14 }
 0x6f1   : > { %p1641_p2 = pnand %p1640_p1, %p2085_p0  ;;  %p1647_p7 = scmp.lt.s32.totalorder %s1645_s30, %s1639_s10 }
 0x6f3   : > { %p1642_p6 = pneg %p1641_p2  ;;  %p1648_p9 = por %p1647_p7, %p1646_p12 }
 0x6f5   : > { %p1649_p13 = pnand %p1648_p9, %p1642_p6 }
 0x79e   : > { %v1138_v28 = vpop.f32.mrf.mxu0 }
 0x79f   : > { %v1139_v29 = vadd.f32 %v1328_v27, %v1138_v28 }
 0x7a0   : > { %v1425_v30 = vpop.f32.mrf.mxu0 }
 0x7a1   : > { %1142 = vst.msk [vmem:[%s272_s16] sm:$0xff] %vm285_vm1, %v1139_v29 }
 0x7a2   : > { %1652 = shalt.err (!%p1649_p13)
}
 0x7a3   : > { %s1653_s29 = scalar_lea.hbm %s2026_s11, 128  ;;  %s1657_s6 = scalar_lea.hbm %s2068_s4, 256 }
 0x7a4   : > { %p1654_p5 = scmp.ne.s32.totalorder %s2026_s11, %s1653_s29  ;;  %p1658_p8 = scmp.lt.s32.totalorder %s2026_s11, %s2068_s4 }
 0x7a5   : > { %p1659_p3 = scmp.lt.s32.totalorder %s1657_s6, %s1653_s29 }
 0x7a6   : > { %p1655_p10 = pnand %p1654_p5, %p2085_p0 }
 0x7a7   : > { %p1660_p11 = por %p1659_p3, %p1658_p8 }
 0x7a8   : > { %p1656_p4 = pneg %p1655_p10 }
 0x7aa   : > { %p1661_p1 = pnand %p1660_p11, %p1656_p4 }
 0x7ac   : > { %1664 = shalt.err (!%p1661_p1)
}
 0x7ad   : > { %1436 = dma.vmem_to_hbm [thread:$0]  (%p2085_p0), %s1163_s24, 128, %s2026_s11, %s1144_s17  }
 0x7ae PF: > { %s1190_s28 = sand.u32 1, %s1699_s18   ;;  %p2086_p2 = scmp.ne.s32.totalorder %s2075_s25, 0 }
 0x7af   : > { %p2087_p6 = scmp.ge.s32.totalorder %s1711_s21, 2  ;;  %s1191_s16 = scalar_lea.sflag [#allocation5], %s1190_s28 }
 0x7b1   : > { %p1452_p12 = pnand %p2087_p6, %p2086_p2 }
 0x7b3   : > { %p1453_p7 = pneg %p1452_p12 }
 0x7b5   : > { %1690 = dma.done.wait (%p1453_p7), %s1191_s16, 128  }
 0x7b6   : > { %1692 = vsyncadd (%p1453_p7), %s1191_s16, 4294967168  ;;  %s1200_s26 = scalar_lea.sflag [#allocation11], %s1190_s28 }
 0x7b7   : > { %1694 = dma.done.wait (%p1453_p7), %s1200_s26, 512  }
 0x7b8   : > { %1696 = vsyncadd (%p1453_p7), %s1200_s26, 4294966784  ;;  %p23_p0 = scmp.ge.s32.totalorder %s1839_s15, 4   ;;  %s2088_s18 = smov %s1703_s19 }
 0x7b9   : > { %s2089_s19 = smov %s1707_s20  ;;  %s2090_s20 = smov %s1855_s27 }
 0x7ba   : > { %s2091_s21 = smov %s1839_s15  ;;  %25 = sbr.rel (!%p23_p0) target bundleno = 8 (0x8), region = 109 }
 0x7bf   :  { %1205 = vsyncpa [#allocation4], 1 }
 0x7c0   :  { %1207 = vsyncpa [#allocation4 + $0x1], 1 }
 0x7c1   :  { %1208 = vsyncpa [#allocation7], 1 }
 0x7c2   :  { %1209 = vsyncpa [#allocation5], 1 }
 0x7c3   :  { %1211 = vsyncpa [#allocation5 + $0x1], 1 }
 0x7c4   :  { %1212 = vsyncpa [#allocation11], 1 }
 0x7c5   :  { %1214 = vsyncpa [#allocation11 + $0x1], 1 }

</bundles_post_ra>
